<compile_context>
chip_gen: v5e
topology: v5e:2x2
jax: 0.10.0
libtpu: 0.0.40
codegen_flags: <defaults>
</compile_context>

<pallas_src>
import jax
import jax.numpy as jnp
from jax.experimental import pallas as pl
from jax.experimental.pallas import tpu as pltpu


def gcn_norm_dense(edge_index, num_nodes):
    """Dense D^-1/2 (A + I) D^-1/2 (PyG gcn_norm semantics, add_self_loops=True)."""
    row, col = edge_index
    adj = jnp.zeros((num_nodes, num_nodes), jnp.float32)
    adj = adj.at[row, col].set(1.0)
    adj = adj + jnp.eye(num_nodes, dtype=jnp.float32)
    deg = jnp.sum(adj, axis=1)
    dinv = jax.lax.rsqrt(deg)
    return adj * dinv[:, None] * dinv[None, :]


def gprgnn_forward(a_hat, x, params, *, K):
    """Fused GPRGNN forward as one pallas_call with a (K+1,) phase grid."""
    N, F = x.shape
    H = params["w1"].shape[1]
    C = params["w2"].shape[1]
    f32 = jnp.float32
    bf16 = jnp.bfloat16
    Cp = ((C + 127) // 128) * 128  # lane-dense (padded) class dimension

    # bf16 operands for the MXU; zero-pad the class dimension of lin2.
    a_bf = a_hat.astype(bf16)
    x_bf = x.astype(bf16)
    w1_bf = params["w1"].astype(bf16)
    b1 = params["b1"].astype(f32)
    w2p = jnp.zeros((H, Cp), bf16).at[:, :C].set(params["w2"].astype(bf16))
    b2p = jnp.zeros((1, Cp), f32).at[:, :C].set(params["b2"].astype(f32))
    temp = params["temp"].astype(f32)

    # Rough resident-VMEM requirement (Pallas double-buffers each spec'd array).
    needed = (
        2 * N * N * 2            # A_hat (bf16)
        + 2 * N * F * 2          # x (bf16)
        + 2 * N * Cp * 4         # output accumulator (f32)
        + 2 * N * Cp * 4         # z double-buffer scratch (f32)
        + 4 * (F * H + H * Cp) * 2 + 4 * (H + Cp) * 4   # weights / biases
    )
    # TODO(synk): for graphs where the dense A_hat no longer fits resident VMEM,
    # fall back to streaming (tm, N) row blocks of A per hop (or block-sparse
    # tiles via scalar-prefetched column-block lists).
    assert needed <= (60 << 20), "dense A_hat does not fit resident VMEM"
    vmem_limit = int(min(max(needed + (8 << 20), 32 << 20), 64 << 20))

    def kernel(temp_ref, x_ref, a_ref, w1_ref, b1_ref, w2_ref, b2_ref,
               out_ref, zbuf_ref):
        # zbuf_ref: (2, N, Cp) f32 -- slots holding z_{p-1} / z_p
        # out_ref : (N, Cp)  f32 resident accumulator  sum_k temp[k] * z_k
        p = pl.program_id(0)  # phase: 0 = MLP, 1..K = propagation hop p

        @pl.when(p == 0)
        def _mlp():
            # dropout(p) is identity in eval mode (training=False)
            h = jnp.dot(x_ref[...], w1_ref[...],
                        preferred_element_type=f32) + b1_ref[...]
            h = jnp.maximum(h, 0.0)
            z0 = jnp.dot(h.astype(bf16), w2_ref[...],
                         preferred_element_type=f32) + b2_ref[...]
            zbuf_ref[0] = z0
            out_ref[...] = temp_ref[0] * z0

        @pl.when(p > 0)
        def _prop():
            rs = (p + 1) % 2            # slot holding z_{p-1}
            ws = p % 2                  # slot receiving z_p
            zsrc = zbuf_ref[rs].astype(bf16)                      # (N, Cp) bf16
            znew = jnp.dot(a_ref[...], zsrc,
                           preferred_element_type=f32)            # (N, Cp) f32
            out_ref[...] = out_ref[...] + temp_ref[p] * znew
            zbuf_ref[ws] = znew

        @pl.when(p == K)
        def _final():
            hsum = out_ref[...]                                   # (N, Cp)
            col = jax.lax.broadcasted_iota(jnp.int32, hsum.shape, 1)
            valid = col < C                                       # mask padded classes
            hm = jnp.where(valid, hsum, -jnp.inf)
            mx = jnp.max(hm, axis=1, keepdims=True)
            zc = hm - mx
            lse = jnp.log(jnp.sum(jnp.exp(zc), axis=1, keepdims=True))
            out_ref[...] = jnp.where(valid, zc - lse, 0.0)

    grid_spec = pltpu.PrefetchScalarGridSpec(
        num_scalar_prefetch=0,
        grid=(K + 1,),
        in_specs=[
            # GPR temp coefficients: scalars, read per-hop from SMEM
            pl.BlockSpec(memory_space=pltpu.MemorySpace.SMEM),
            # all tensor operands fully resident (constant block index -> 1 DMA)
            pl.BlockSpec((N, F), lambda p: (0, 0)),    # x
            pl.BlockSpec((N, N), lambda p: (0, 0)),    # A_hat
            pl.BlockSpec((F, H), lambda p: (0, 0)),    # W1
            pl.BlockSpec((1, H), lambda p: (0, 0)),    # b1
            pl.BlockSpec((H, Cp), lambda p: (0, 0)),   # W2 (class-padded)
            pl.BlockSpec((1, Cp), lambda p: (0, 0)),   # b2 (class-padded)
        ],
        # resident output accumulator: single writeback at the end of the grid
        out_specs=pl.BlockSpec((N, Cp), lambda p: (0, 0)),
        scratch_shapes=[pltpu.VMEM((2, N, Cp), f32)],  # z_{k-1} / z_k double buffer
    )

    out_padded = pl.pallas_call(
        kernel,
        out_shape=jax.ShapeDtypeStruct((N, Cp), f32),
        grid_spec=grid_spec,
        compiler_params=pltpu.CompilerParams(
            # hop k+1 needs hop k (via scratch) -> phase axis must be sequential
            dimension_semantics=("arbitrary",),
            vmem_limit_bytes=vmem_limit,
        ),
    )(temp, x_bf, a_bf, w1_bf, b1, w2p, b2p)
    return out_padded[:, :C]


def gprgnn_reference(a_hat, x, params, K):
    """Pure-JAX f32 reference of the same forward pass."""
    h = jnp.maximum(x @ params["w1"] + params["b1"], 0.0)
    z = h @ params["w2"] + params["b2"]
    temp = params["temp"]
    hidden = temp[0] * z
    for k in range(K):
        z = a_hat @ z
        hidden = hidden + temp[k + 1] * z
    return jax.nn.log_softmax(hidden, axis=1)


def init_params(key, in_features, hidden, num_classes, K, alpha):
    ks = jax.random.split(key, 4)
    s = 0.1
    # PPR init of the GPR coefficients (Init='PPR')
    temp = alpha * (1.0 - alpha) ** jnp.arange(K + 1, dtype=jnp.float32)
    temp = temp.at[K].set((1.0 - alpha) ** K)
    return {
        "w1": s * jax.random.normal(ks[0], (in_features, hidden), jnp.float32),
        "b1": s * jax.random.normal(ks[1], (1, hidden), jnp.float32),
        "w2": s * jax.random.normal(ks[2], (hidden, num_classes), jnp.float32),
        "b2": s * jax.random.normal(ks[3], (1, num_classes), jnp.float32),
        "temp": temp.astype(jnp.float32),
    }


if __name__ == "__main__":
    key = jax.random.PRNGKey(0)
    N = 64          # num nodes
    F_IN = 16       # dataset.num_features
    HIDDEN = 32     # args.hidden
    C_OUT = 4       # dataset.num_classes
    K = 10          # args.K
    ALPHA = 0.1     # args.alpha

    k_x, k_p = jax.random.split(key)
    x = jax.random.normal(k_x, (N, F_IN), jnp.float32)

    # undirected ring graph (both directions), no self loops in edge_index
    src = jnp.arange(N, dtype=jnp.int32)
    dst = (src + 1) % N
    edge_index = jnp.stack(
        [jnp.concatenate([src, dst]), jnp.concatenate([dst, src])], axis=0
    )  # (2, 128)

    a_hat = gcn_norm_dense(edge_index, N)
    params = init_params(k_p, F_IN, HIDDEN, C_OUT, K, ALPHA)

    out = gprgnn_forward(a_hat, x, params, K=K)
    jax.block_until_ready(out)

    assert out.shape == (N, C_OUT)
    assert bool(jnp.all(jnp.isfinite(out)))
    ref = gprgnn_reference(a_hat, x, params, K)
    max_err = float(jnp.max(jnp.abs(out - ref)))
    assert max_err < 5e-2, f"mismatch vs f32 reference: max_err={max_err}"
    print("KERNEL_OK")
</pallas_src>

<mosaic_0001>
module attributes {stable_mosaic.version = 11 : i64} {
  func.func @kernel(%arg0: i32, %arg1: memref<11xf32, #tpu.memory_space<smem>>, %arg2: memref<64x16xbf16, #tpu.memory_space<vmem>>, %arg3: memref<64x64xbf16, #tpu.memory_space<vmem>>, %arg4: memref<16x32xbf16, #tpu.memory_space<vmem>>, %arg5: memref<1x32xf32, #tpu.memory_space<vmem>>, %arg6: memref<32x128xbf16, #tpu.memory_space<vmem>>, %arg7: memref<1x128xf32, #tpu.memory_space<vmem>>, %arg8: memref<64x128xf32, #tpu.memory_space<vmem>>, %arg9: memref<2x64x128xf32, #tpu.memory_space<vmem>>) attributes {dimension_semantics = [#tpu.dimension_semantics<arbitrary>], iteration_bounds = array<i64: 11>, scalar_prefetch = 0 : i64, scratch_operands = 1 : i64, tpu.core_type = #tpu.core_type<tc>, window_params = [{transform_indices = @transform_0, window_bounds = array<i64: 11>}, {pipeline_mode = #tpu.pipeline_mode<synchronous>, transform_indices = @transform_1, window_bounds = array<i64: 64, 16>}, {pipeline_mode = #tpu.pipeline_mode<synchronous>, transform_indices = @transform_2, window_bounds = array<i64: 64, 64>}, {pipeline_mode = #tpu.pipeline_mode<synchronous>, transform_indices = @transform_3, window_bounds = array<i64: 16, 32>}, {pipeline_mode = #tpu.pipeline_mode<synchronous>, transform_indices = @transform_4, window_bounds = array<i64: 1, 32>}, {pipeline_mode = #tpu.pipeline_mode<synchronous>, transform_indices = @transform_5, window_bounds = array<i64: 32, 128>}, {pipeline_mode = #tpu.pipeline_mode<synchronous>, transform_indices = @transform_6, window_bounds = array<i64: 1, 128>}, {pipeline_mode = #tpu.pipeline_mode<synchronous>, transform_indices = @transform_7, window_bounds = array<i64: 64, 128>}]} {
    %c0_i32 = arith.constant 0 : i32
    %0 = arith.cmpi eq, %arg0, %c0_i32 : i32
    %1 = arith.extui %0 : i1 to i32
    %c0_i32_0 = arith.constant 0 : i32
    %2 = arith.cmpi ne, %1, %c0_i32_0 : i32
    scf.if %2 {
      %c0 = arith.constant 0 : index
      %c0_4 = arith.constant 0 : index
      %9 = vector.load %arg2[%c0, %c0_4] : memref<64x16xbf16, #tpu.memory_space<vmem>>, vector<64x16xbf16>
      %c0_5 = arith.constant 0 : index
      %c0_6 = arith.constant 0 : index
      %10 = vector.load %arg4[%c0_5, %c0_6] : memref<16x32xbf16, #tpu.memory_space<vmem>>, vector<16x32xbf16>
      %cst = arith.constant dense<0.000000e+00> : vector<64x32xf32>
      %11 = tpu.matmul %9, %10, %cst {dimension_numbers = #tpu.dot_dimension_numbers<[1], [0], [0], [1], [0, 0, 1, 1], [], []>} : vector<64x16xbf16>, vector<16x32xbf16>, vector<64x32xf32> -> vector<64x32xf32>
      %c0_7 = arith.constant 0 : index
      %c0_8 = arith.constant 0 : index
      %12 = vector.load %arg5[%c0_7, %c0_8] : memref<1x32xf32, #tpu.memory_space<vmem>>, vector<1x32xf32>
      %13 = vector.broadcast %12 : vector<1x32xf32> to vector<64x32xf32>
      %14 = arith.addf %11, %13 : vector<64x32xf32>
      %cst_9 = arith.constant 0.000000e+00 : f32
      %15 = vector.broadcast %cst_9 : f32 to vector<64x32xf32>
      %16 = arith.maximumf %14, %15 : vector<64x32xf32>
      %17 = arith.truncf %16 : vector<64x32xf32> to vector<64x32xbf16>
      %c0_10 = arith.constant 0 : index
      %c0_11 = arith.constant 0 : index
      %18 = vector.load %arg6[%c0_10, %c0_11] : memref<32x128xbf16, #tpu.memory_space<vmem>>, vector<32x128xbf16>
      %cst_12 = arith.constant dense<0.000000e+00> : vector<64x128xf32>
      %19 = tpu.matmul %17, %18, %cst_12 {dimension_numbers = #tpu.dot_dimension_numbers<[1], [0], [0], [1], [0, 0, 1, 1], [], []>} : vector<64x32xbf16>, vector<32x128xbf16>, vector<64x128xf32> -> vector<64x128xf32>
      %c0_13 = arith.constant 0 : index
      %c0_14 = arith.constant 0 : index
      %20 = vector.load %arg7[%c0_13, %c0_14] : memref<1x128xf32, #tpu.memory_space<vmem>>, vector<1x128xf32>
      %21 = vector.broadcast %20 : vector<1x128xf32> to vector<64x128xf32>
      %22 = arith.addf %19, %21 : vector<64x128xf32>
      %c0_15 = arith.constant 0 : index
      %c0_16 = arith.constant 0 : index
      %c0_17 = arith.constant 0 : index
      %23 = vector.load %arg9[%c0_15, %c0_16, %c0_17] : memref<2x64x128xf32, #tpu.memory_space<vmem>>, vector<1x64x128xf32>
      %24 = vector.shape_cast %23 : vector<1x64x128xf32> to vector<64x128xf32>
      %25 = vector.shape_cast %22 : vector<64x128xf32> to vector<1x64x128xf32>
      tpu.vector_store %arg9[%c0_15, %c0_16, %c0_17], %25 {strides = array<i32>} : memref<2x64x128xf32, #tpu.memory_space<vmem>>, vector<1x64x128xf32>,
      %c0_18 = arith.constant 0 : index
      %26 = memref.load %arg1[%c0_18] : memref<11xf32, #tpu.memory_space<smem>>
      %27 = vector.broadcast %26 : f32 to vector<64x128xf32>
      %28 = arith.mulf %27, %22 : vector<64x128xf32>
      %c0_19 = arith.constant 0 : index
      %c0_20 = arith.constant 0 : index
      %29 = vector.load %arg8[%c0_19, %c0_20] : memref<64x128xf32, #tpu.memory_space<vmem>>, vector<64x128xf32>
      tpu.vector_store %arg8[%c0_19, %c0_20], %28 {strides = array<i32>} : memref<64x128xf32, #tpu.memory_space<vmem>>, vector<64x128xf32>,
    } else {
    }
    %c0_i32_1 = arith.constant 0 : i32
    %3 = arith.cmpi sgt, %arg0, %c0_i32_1 : i32
    %4 = arith.extui %3 : i1 to i32
    %c0_i32_2 = arith.constant 0 : i32
    %5 = arith.cmpi ne, %4, %c0_i32_2 : i32
    scf.if %5 {
      %c1_i32 = arith.constant 1 : i32
      %9 = arith.addi %arg0, %c1_i32 : i32
      %c2_i32 = arith.constant 2 : i32
      %c0_i32_4 = arith.constant 0 : i32
      %10 = arith.cmpi eq, %c2_i32, %c0_i32_4 : i32
      %c1_i32_5 = arith.constant 1 : i32
      %11 = arith.select %10, %c1_i32_5, %c2_i32 : i32
      %12 = arith.remsi %9, %11 : i32
      %c0_i32_6 = arith.constant 0 : i32
      %13 = arith.cmpi ne, %12, %c0_i32_6 : i32
      %c0_i32_7 = arith.constant 0 : i32
      %14 = arith.cmpi slt, %12, %c0_i32_7 : i32
      %c0_i32_8 = arith.constant 0 : i32
      %15 = arith.cmpi slt, %11, %c0_i32_8 : i32
      %16 = arith.xori %14, %15 : i1
      %17 = arith.andi %16, %13 : i1
      %18 = arith.addi %12, %11 : i32
      %19 = arith.select %17, %18, %12 : i32
      %c2_i32_9 = arith.constant 2 : i32
      %c0_i32_10 = arith.constant 0 : i32
      %20 = arith.cmpi eq, %c2_i32_9, %c0_i32_10 : i32
      %c1_i32_11 = arith.constant 1 : i32
      %21 = arith.select %20, %c1_i32_11, %c2_i32_9 : i32
      %22 = arith.remsi %arg0, %21 : i32
      %c0_i32_12 = arith.constant 0 : i32
      %23 = arith.cmpi ne, %22, %c0_i32_12 : i32
      %c0_i32_13 = arith.constant 0 : i32
      %24 = arith.cmpi slt, %22, %c0_i32_13 : i32
      %c0_i32_14 = arith.constant 0 : i32
      %25 = arith.cmpi slt, %21, %c0_i32_14 : i32
      %26 = arith.xori %24, %25 : i1
      %27 = arith.andi %26, %23 : i1
      %28 = arith.addi %22, %21 : i32
      %29 = arith.select %27, %28, %22 : i32
      %30 = arith.index_cast %19 : i32 to index
      %c0 = arith.constant 0 : index
      %c0_15 = arith.constant 0 : index
      %31 = vector.load %arg9[%30, %c0, %c0_15] : memref<2x64x128xf32, #tpu.memory_space<vmem>>, vector<1x64x128xf32>
      %32 = vector.shape_cast %31 : vector<1x64x128xf32> to vector<64x128xf32>
      %33 = arith.truncf %32 : vector<64x128xf32> to vector<64x128xbf16>
      %c0_16 = arith.constant 0 : index
      %c0_17 = arith.constant 0 : index
      %34 = vector.load %arg3[%c0_16, %c0_17] : memref<64x64xbf16, #tpu.memory_space<vmem>>, vector<64x64xbf16>
      %cst = arith.constant dense<0.000000e+00> : vector<64x128xf32>
      %35 = tpu.matmul %34, %33, %cst {dimension_numbers = #tpu.dot_dimension_numbers<[1], [0], [0], [1], [0, 0, 1, 1], [], []>} : vector<64x64xbf16>, vector<64x128xbf16>, vector<64x128xf32> -> vector<64x128xf32>
      %c0_18 = arith.constant 0 : index
      %c0_19 = arith.constant 0 : index
      %36 = vector.load %arg8[%c0_18, %c0_19] : memref<64x128xf32, #tpu.memory_space<vmem>>, vector<64x128xf32>
      %37 = arith.index_cast %arg0 : i32 to index
      %38 = memref.load %arg1[%37] : memref<11xf32, #tpu.memory_space<smem>>
      %39 = vector.broadcast %38 : f32 to vector<64x128xf32>
      %40 = arith.mulf %39, %35 : vector<64x128xf32>
      %41 = arith.addf %36, %40 : vector<64x128xf32>
      %c0_20 = arith.constant 0 : index
      %c0_21 = arith.constant 0 : index
      %42 = vector.load %arg8[%c0_20, %c0_21] : memref<64x128xf32, #tpu.memory_space<vmem>>, vector<64x128xf32>
      tpu.vector_store %arg8[%c0_20, %c0_21], %41 {strides = array<i32>} : memref<64x128xf32, #tpu.memory_space<vmem>>, vector<64x128xf32>,
      %43 = arith.index_cast %29 : i32 to index
      %c0_22 = arith.constant 0 : index
      %c0_23 = arith.constant 0 : index
      %44 = vector.load %arg9[%43, %c0_22, %c0_23] : memref<2x64x128xf32, #tpu.memory_space<vmem>>, vector<1x64x128xf32>
      %45 = vector.shape_cast %44 : vector<1x64x128xf32> to vector<64x128xf32>
      %46 = vector.shape_cast %35 : vector<64x128xf32> to vector<1x64x128xf32>
      tpu.vector_store %arg9[%43, %c0_22, %c0_23], %46 {strides = array<i32>} : memref<2x64x128xf32, #tpu.memory_space<vmem>>, vector<1x64x128xf32>,
    } else {
    }
    %c10_i32 = arith.constant 10 : i32
    %6 = arith.cmpi eq, %arg0, %c10_i32 : i32
    %7 = arith.extui %6 : i1 to i32
    %c0_i32_3 = arith.constant 0 : i32
    %8 = arith.cmpi ne, %7, %c0_i32_3 : i32
    scf.if %8 {
      %c0 = arith.constant 0 : index
      %c0_4 = arith.constant 0 : index
      %9 = vector.load %arg8[%c0, %c0_4] : memref<64x128xf32, #tpu.memory_space<vmem>>, vector<64x128xf32>
      %10 = tpu.iota {dimensions = array<i32: 1>} : vector<64x128xi32>
      %c4_i32 = arith.constant 4 : i32
      %11 = vector.broadcast %c4_i32 : i32 to vector<64x128xi32>
      %12 = arith.cmpi slt, %10, %11 : vector<64x128xi32>
      %cst = arith.constant 0xFF800000 : f32
      %13 = vector.broadcast %cst : f32 to vector<64x128xf32>
      %14 = arith.select %12, %9, %13 : vector<64x128xi1>, vector<64x128xf32>
      %cst_5 = arith.constant dense<0xFF800000> : vector<64xf32>
      %15 = vector.multi_reduction <maximumf>, %14, %cst_5 [1] : vector<64x128xf32> to vector<64xf32>
      %16 = vector.shape_cast %15 : vector<64xf32> to vector<64x1xf32>
      %17 = vector.broadcast %16 : vector<64x1xf32> to vector<64x128xf32>
      %18 = arith.subf %14, %17 : vector<64x128xf32>
      %19 = math.exp %18 : vector<64x128xf32>
      %cst_6 = arith.constant dense<0.000000e+00> : vector<64xf32>
      %20 = vector.multi_reduction <add>, %19, %cst_6 [1] : vector<64x128xf32> to vector<64xf32>
      %21 = vector.shape_cast %20 : vector<64xf32> to vector<64x1xf32>
      %22 = math.log %21 : vector<64x1xf32>
      %23 = vector.broadcast %22 : vector<64x1xf32> to vector<64x128xf32>
      %24 = arith.subf %18, %23 : vector<64x128xf32>
      %cst_7 = arith.constant 0.000000e+00 : f32
      %25 = vector.broadcast %cst_7 : f32 to vector<64x128xf32>
      %26 = arith.select %12, %24, %25 : vector<64x128xi1>, vector<64x128xf32>
      %c0_8 = arith.constant 0 : index
      %c0_9 = arith.constant 0 : index
      %27 = vector.load %arg8[%c0_8, %c0_9] : memref<64x128xf32, #tpu.memory_space<vmem>>, vector<64x128xf32>
      tpu.vector_store %arg8[%c0_8, %c0_9], %26 {strides = array<i32>} : memref<64x128xf32, #tpu.memory_space<vmem>>, vector<64x128xf32>,
    } else {
    }
    return
  }
  func.func @transform_0(%arg0: i32) -> i32 {
    %c0_i32 = arith.constant 0 : i32
    %c0_i32_0 = arith.constant 0 : i32
    return %c0_i32 : i32
  }
  func.func @transform_1(%arg0: i32) -> (i32, i32) {
    %c0_i32 = arith.constant 0 : i32
    %c0_i32_0 = arith.constant 0 : i32
    %c0_i32_1 = arith.constant 0 : i32
    return %c0_i32, %c0_i32_0 : i32, i32
  }
  func.func @transform_2(%arg0: i32) -> (i32, i32) {
    %c0_i32 = arith.constant 0 : i32
    %c0_i32_0 = arith.constant 0 : i32
    %c0_i32_1 = arith.constant 0 : i32
    return %c0_i32, %c0_i32_0 : i32, i32
  }
  func.func @transform_3(%arg0: i32) -> (i32, i32) {
    %c0_i32 = arith.constant 0 : i32
    %c0_i32_0 = arith.constant 0 : i32
    %c0_i32_1 = arith.constant 0 : i32
    return %c0_i32, %c0_i32_0 : i32, i32
  }
  func.func @transform_4(%arg0: i32) -> (i32, i32) {
    %c0_i32 = arith.constant 0 : i32
    %c0_i32_0 = arith.constant 0 : i32
    %c0_i32_1 = arith.constant 0 : i32
    return %c0_i32, %c0_i32_0 : i32, i32
  }
  func.func @transform_5(%arg0: i32) -> (i32, i32) {
    %c0_i32 = arith.constant 0 : i32
    %c0_i32_0 = arith.constant 0 : i32
    %c0_i32_1 = arith.constant 0 : i32
    return %c0_i32, %c0_i32_0 : i32, i32
  }
  func.func @transform_6(%arg0: i32) -> (i32, i32) {
    %c0_i32 = arith.constant 0 : i32
    %c0_i32_0 = arith.constant 0 : i32
    %c0_i32_1 = arith.constant 0 : i32
    return %c0_i32, %c0_i32_0 : i32, i32
  }
  func.func @transform_7(%arg0: i32) -> (i32, i32) {
    %c0_i32 = arith.constant 0 : i32
    %c0_i32_0 = arith.constant 0 : i32
    %c0_i32_1 = arith.constant 0 : i32
    return %c0_i32, %c0_i32_0 : i32, i32
  }
}

</mosaic_0001>

<bundles_post_ra>
// kernel: tpu_custom_call.1
= control target key start
LH: loop header
LB: loop body
LE: loop exit
PB: predicated region body
PF: predicated region fallthrough
CT: control target
= control target key end

     0   :  { %12 = vsyncpa [#allocation6], 0  ;;  %s1289_s0 = inlined_call_operand.vmem [shape: f32[11], index: 0, kind: input, shape index: {}]   ;;  %s1290_s1 = inlined_call_operand.vmem [shape: bf16[64,16], index: 1, kind: input, shape index: {}]   ;;  %s1291_s2 = inlined_call_operand.vmem [shape: bf16[64,64], index: 2, kind: input, shape index: {}]   ;;  %s1292_s3 = inlined_call_operand.vmem [shape: bf16[16,32], index: 3, kind: input, shape index: {}]   ;;  %s1293_s4 = inlined_call_operand.vmem [shape: f32[1,32], index: 4, kind: input, shape index: {}]   ;;  %s1294_s5 = inlined_call_operand.hbm [shape: bf16[32,128], index: 5, kind: input, shape index: {}]   ;;  %s1295_s6 = inlined_call_operand.vmem [shape: f32[1,128], index: 6, kind: input, shape index: {}]   ;;  %s1296_s7 = inlined_call_operand.hbm [shape: f32[64,128], index: 7, kind: output, shape index: {}]  }
   0x1   :  { %13 = vsyncpa [#allocation4], 0 }
   0x2   :  { %14 = vsyncpa [#allocation5], 0  ;;  %s1123_s24 = smov 0  }
   0x3 LB: > { %s205_s27 = sshll.u32 %s1289_s0, 4  ;;  %s1132_s28 = sadd.s32 4294967295, %s1074_s24   ;;  %s1074_s24 = sphi %s1123_s24, %s20_s24   ;;  %s206_s27 = int_to_ptr.vmem [resolvable:$true] %s205_s27 }
   0x4   : > { %p806_p0 = scmp.ge.s32.totalorder %s1074_s24, 1  ;;  %p193_p1 = scmp.lt.s32.totalorder %s1074_s24, 12 }
   0x5   : > { %p807_p2 = scmp.ne.s32.totalorder %s1132_s28, 0  ;;  %p928_p3 = scmp.eq.s32.totalorder %s1132_s28, 0 }
   0x6   : > { %p1138_p4 = pnand %p806_p0, %p193_p1  ;;  %s226_s9 = sshll.u32 %s1294_s5, 4  ;;  %s227_s9 = int_to_ptr.hbm [resolvable:$true] %s226_s9 }
   0x7   : > { %s1076_s10 = smov [#allocation7]   ;;  %s1077_s12 = smov [#allocation3]  }
   0x8   : > { %p921_p5 = pneg %p1138_p4  ;;  %s228_s11 = sshll.u32 %s1076_s10, 4  ;;  %s229_s11 = int_to_ptr.vmem [resolvable:$true] %s228_s11 }
   0x9   : > { %s1078_s13 = smov 64   ;;  %s1079_s14 = smov 4  }
   0xa   : > { %p922_p6 = pnand %p928_p3, %p921_p5  ;;  %247 = sbr.rel (%p1138_p4) target bundleno = 831 (0x33f), region = 48 }
   0xc   : > { %924 = dma.vmem_to_smem (!%p922_p6), %s206_s27, 16, %s1077_s12, [#allocation6]  }
   0xd   : > { %927 = dma.hbm_to_vmem [thread:$0]  (!%p922_p6), %s227_s9, 256, %s229_s11, [#allocation4], %s1078_s13, %s1078_s13, %s1079_s14  }
   0xf   : > { %1061 = dma.done.wait (%p928_p3), [#allocation6], 16  }
  0x10   : > { %1063 = vsyncadd (%p928_p3), [#allocation6], 4294967280 }
  0x11   : > { %1065 = dma.done.wait (%p928_p3), [#allocation4], 256  }
  0x12   : > { %1067 = vsyncadd (%p928_p3), [#allocation4], 4294967040 }
  0x13   : > { %259 = sfence }
  0x14   : > { %280 = sbr.rel (%p807_p2) target bundleno = 352 (0x160), region = 60  ;;  %s445_s29 = sld [smem:[#allocation3]] (!%p807_p2) }
  0x19   : > { %v887_v0 = vld [vmem:[%s1292_s3] sm:$0xff]  ;;  %v884_v2 = vld [vmem:[%s1290_s1 + $0x8] sm:$0xff]  ;;  %vm321_vm0 = vcmask 130048   ;;  %v885_v3 = vld [vmem:[%s1290_s1 + $0x10] sm:$0xff]  ;;  %vm395_vm1 = vcmask 261120  }
  0x1a   : > { %v883_v1 = vld [vmem:[%s1290_s1] sm:$0xff]  ;;  %341 = vmatpush.bf16.msra.mxu0 %v887_v0  ;;  %894 = vmatpush.bf16.msra.mxu3 %v887_v0  ;;  %v886_v4 = vld [vmem:[%s1290_s1 + $0x18] sm:$0xff]  ;;  %v889_v5 = vld [vmem:[#allocation7 + $0x8] sm:$0xff]  ;;  %v446_v39 = vstv %s445_s29 }
  0x1b   : > { %414 = vmatpush.bf16.msra.mxu1 %v889_v5  ;;  %895 = vmatpush.bf16.msra.mxu2 %v889_v5  ;;  %v888_v6 = vld [vmem:[#allocation7] sm:$0xff] }
  0x1c   : > { %v949_v8 = vld [vmem:[%s1293_s4] ss:$0 sm:$0xff] }
  0x1d   : > { %833 = vmatmul.msk.bf16.vlgmr.msra.gmra.mxu0 %vm321_vm0, %v883_v1  ;;  %834 = vmatmul.msk.bf16.vlgmr.msra.gmra.mxu3 %vm321_vm0, %v884_v2  ;;  %v950_v36 = vld [vmem:[%s1295_s6] ss:$0 sm:$0xff] }
  0x1f   : > { %415 = vmatpush.bf16.msra.mxu1 %v888_v6  ;;  %896 = vmatpush.bf16.msra.mxu2 %v888_v6 }
  0x2d   : > { %835 = vmatmul.msk.bf16.gmra.mxu3 %vm321_vm0, %v885_v3 }
  0x3d   : > { %836 = vmatmul.msk.bf16.gmra.mxu3 %vm321_vm0, %v886_v4 }
  0x9a   : > { %v343_v7 = vpop.f32.mrf.mxu0 }
  0x9b   : > { %v344_v9 = vadd.f32 %v949_v8, %v343_v7 }
  0x9d   : > { %v363_v12 = vmax.f32 %v344_v9, 0.0 }
  0xa0   : > { %v348_v10 = vpop.f32.mrf.mxu3 }
  0xa1   : > { %v349_v19 = vadd.f32 %v949_v8, %v348_v10 }
  0xa2   : > { %v345_v11 = vpop.f32.mrf.mxu0 }
  0xa3   : > { %v346_v13 = vadd.f32 %v949_v8, %v345_v11  ;;  %v365_v21 = vmax.f32 %v349_v19, 0.0 }
  0xa5   : > { %v364_v14 = vmax.f32 %v346_v13, 0.0 }
  0xa7   : > { %v371_v15 = vpack.c.bf16 %v364_v14, %v363_v12 }
  0xa8   : > { %v350_v16 = vpop.f32.mrf.mxu3 }
  0xa9   : > { %845 = vmatmul.msk.bf16.vlgmr.msra.gmra.mxu1 %vm395_vm1, %v371_v15  ;;  %v351_v17 = vadd.f32 %v949_v8, %v350_v16 }
  0xab   : > { %v366_v20 = vmax.f32 %v351_v17, 0.0 }
  0xad   : > { %v372_v22 = vpack.c.bf16 %v366_v20, %v365_v21 }
  0xb0   : > { %v353_v18 = vpop.f32.mrf.mxu3 }
  0xb1   : > { %v354_v23 = vadd.f32 %v949_v8, %v353_v18 }
  0xb3   : > { %v367_v26 = vmax.f32 %v354_v23, 0.0 }
  0xb8   : > { %v355_v24 = vpop.f32.mrf.mxu3 }
  0xb9   : > { %v356_v25 = vadd.f32 %v949_v8, %v355_v24  ;;  %846 = vmatmul.msk.bf16.gmra.mxu1 %vm395_vm1, %v372_v22 }
  0xbb   : > { %v368_v27 = vmax.f32 %v356_v25, 0.0 }
  0xbd   : > { %v373_v28 = vpack.c.bf16 %v368_v27, %v367_v26 }
  0xbf   : > { %847 = vmatmul.msk.bf16.vlgmr.msra.gmra.mxu2 %vm395_vm1, %v373_v28 }
  0xc0   : > { %v358_v29 = vpop.f32.mrf.mxu3 }
  0xc1   : > { %v359_v30 = vadd.f32 %v949_v8, %v358_v29 }
  0xc3   : > { %v369_v33 = vmax.f32 %v359_v30, 0.0 }
  0xc8   : > { %v360_v31 = vpop.f32.mrf.mxu3 }
  0xc9   : > { %v361_v32 = vadd.f32 %v949_v8, %v360_v31 }
  0xcb   : > { %v370_v34 = vmax.f32 %v361_v32, 0.0 }
  0xcd   : > { %v374_v35 = vpack.c.bf16 %v370_v34, %v369_v33 }
  0xcf   : > { %848 = vmatmul.msk.bf16.gmra.mxu2 %vm395_vm1, %v374_v35 }
 0x126   : > { %v417_v37 = vpop.f32.mrf.mxu1 }
 0x127   : > { %v418_v38 = vadd.f32 %v950_v36, %v417_v37 }
 0x129   : > { %437 = vst [vmem:[#allocation2] sm:$0xff] %v418_v38  ;;  %v447_v40 = vmul.f32 %v446_v39, %v418_v38 }
 0x12b   : > { %455 = vst [vmem:[#allocation8] sm:$0xff] %v447_v40 }
 0x12e   : > { %v419_v41 = vpop.f32.mrf.mxu1 }
 0x12f   : > { %v420_v42 = vadd.f32 %v950_v36, %v419_v41 }
 0x131   : > { %438 = vst [vmem:[#allocation2 + $0x8] sm:$0xff] %v420_v42  ;;  %v448_v43 = vmul.f32 %v446_v39, %v420_v42 }
 0x133   : > { %456 = vst [vmem:[#allocation8 + $0x8] sm:$0xff] %v448_v43 }
 0x136   : > { %v422_v44 = vpop.f32.mrf.mxu1 }
 0x137   : > { %v423_v45 = vadd.f32 %v950_v36, %v422_v44 }
 0x139   : > { %439 = vst [vmem:[#allocation2 + $0x10] sm:$0xff] %v423_v45  ;;  %v449_v46 = vmul.f32 %v446_v39, %v423_v45 }
 0x13b   : > { %457 = vst [vmem:[#allocation8 + $0x10] sm:$0xff] %v449_v46 }
 0x13e   : > { %v424_v47 = vpop.f32.mrf.mxu1 }
 0x13f   : > { %v425_v48 = vadd.f32 %v950_v36, %v424_v47 }
 0x141   : > { %440 = vst [vmem:[#allocation2 + $0x18] sm:$0xff] %v425_v48  ;;  %v450_v49 = vmul.f32 %v446_v39, %v425_v48 }
 0x142   : > { %v427_v50 = vpop.f32.mrf.mxu2 }
 0x143   : > { %458 = vst [vmem:[#allocation8 + $0x18] sm:$0xff] %v450_v49  ;;  %v428_v51 = vadd.f32 %v950_v36, %v427_v50 }
 0x145   : > { %441 = vst [vmem:[#allocation2 + $0x20] sm:$0xff] %v428_v51  ;;  %v451_v52 = vmul.f32 %v446_v39, %v428_v51 }
 0x147   : > { %459 = vst [vmem:[#allocation8 + $0x20] sm:$0xff] %v451_v52 }
 0x14a   : > { %v429_v53 = vpop.f32.mrf.mxu2 }
 0x14b   : > { %v430_v54 = vadd.f32 %v950_v36, %v429_v53 }
 0x14d   : > { %442 = vst [vmem:[#allocation2 + $0x28] sm:$0xff] %v430_v54  ;;  %v452_v55 = vmul.f32 %v446_v39, %v430_v54 }
 0x14f   : > { %460 = vst [vmem:[#allocation8 + $0x28] sm:$0xff] %v452_v55 }
 0x152   : > { %v432_v56 = vpop.f32.mrf.mxu2 }
 0x153   : > { %v433_v57 = vadd.f32 %v950_v36, %v432_v56 }
 0x155   : > { %443 = vst [vmem:[#allocation2 + $0x30] sm:$0xff] %v433_v57  ;;  %v453_v58 = vmul.f32 %v446_v39, %v433_v57 }
 0x157   : > { %461 = vst [vmem:[#allocation8 + $0x30] sm:$0xff] %v453_v58 }
 0x15a   : > { %v434_v59 = vpop.f32.mrf.mxu2 }
 0x15b   : > { %v435_v60 = vadd.f32 %v950_v36, %v434_v59 }
 0x15d   : > { %444 = vst [vmem:[#allocation2 + $0x38] sm:$0xff] %v435_v60  ;;  %v454_v61 = vmul.f32 %v446_v39, %v435_v60 }
 0x15f   : > { %462 = vst [vmem:[#allocation8 + $0x38] sm:$0xff] %v454_v61 }
 0x160 PF: > { %p849_p7 = scmp.le.s32.totalorder %s1132_s28, 0 }
 0x161   : > { %s467_s9 = sadd.s32 (!%p849_p7), 1, %s1132_s28  ;;  %s481_s26 = ssub.s32 (!%p849_p7), 0, %s1132_s28 }
 0x162   : > { %466 = sbr.rel (%p849_p7) target bundleno = 530 (0x212), region = 64  ;;  %p468_p8 = scmp.lt.s32.totalorder (!%p849_p7), %s467_s9, 0 }
 0x163   : > { %s469_s10 = ssub.s32 (!%p849_p7), 0, %s467_s9  ;;  %s853_s27 = smin.u32 (!%p849_p7), %s1132_s28, %s481_s26 }
 0x164   : > { %s850_s11 = smin.u32 (!%p849_p7), %s469_s10, %s467_s9  ;;  %s483_s29 = sand.u32 (!%p849_p7), 1, %s853_s27  }
 0x165   : > { %s471_s12 = sand.u32 (!%p849_p7), 1, %s850_s11   ;;  %p480_p10 = scmp.lt.s32.totalorder (!%p849_p7), %s1132_s28, 0 }
 0x166   : > { %s472_s13 = ssub.s32 (!%p849_p7), 0, %s471_s12  ;;  %s484_s30 = ssub.s32 (!%p849_p7), 0, %s483_s29 }
 0x167   : > { %s1299_s13 = smov (!%p468_p8, %s472_s13), %s471_s12  ;;  %v890_v10 = vld [vmem:[%s1291_s2] sm:$0xff]  ;;  %v891_v11 = vld [vmem:[%s1291_s2 + $0x8] sm:$0xff]  ;;  %vm534_vm2 = vcmask 523264   ;;  %v892_v12 = vld [vmem:[%s1291_s2 + $0x10] sm:$0xff]  ;;  %s1303_s30 = smov (!%p480_p10, %s484_s30), %s483_s29 }
 0x168   : > { %p852_p9 = scmp.lt.s32.totalorder %s1299_s13, 0  ;;  %s478_s14 = sadd.s32 2, %s1299_s13  ;;  %v893_v13 = vld [vmem:[%s1291_s2 + $0x18] sm:$0xff]  ;;  %v576_v16 = vld [vmem:[#allocation8] sm:$0xff]  ;;  %v578_v18 = vld [vmem:[#allocation8 + $0x10] sm:$0xff] }
 0x169   : > { %p855_p11 = scmp.lt.s32.totalorder %s1303_s30, 0  ;;  %s490_s8 = sadd.s32 2, %s1303_s30  ;;  %v580_v24 = vld [vmem:[#allocation8 + $0x20] sm:$0xff]  ;;  %v582_v26 = vld [vmem:[#allocation8 + $0x30] sm:$0xff]  ;;  %v577_v30 = vld [vmem:[#allocation8 + $0x8] sm:$0xff] }
 0x16a   : > { %s1301_s14 = smov (!%p852_p9, %s478_s14), %s1299_s13  ;;  %s584_s9 = sld [smem:[#allocation3 + %s1132_s28]]  ;;  %v579_v32 = vld [vmem:[#allocation8 + $0x18] sm:$0xff]  ;;  %v581_v40 = vld [vmem:[#allocation8 + $0x28] sm:$0xff] }
 0x16b   : > { %s856_s15 = sshll.u32 %s1301_s14, 6  ;;  %s1305_s8 = smov (!%p855_p11, %s490_s8), %s1303_s30  ;;  %v583_v42 = vld [vmem:[#allocation8 + $0x38] sm:$0xff] }
 0x16c   : > { %s493_s16 = scalar_lea.vmem [#allocation2], %s856_s15  ;;  %s877_s10 = sshll.u32 %s1305_s8, 6 }
 0x16d   : > { %v500_v62 = vld [vmem:[%s493_s16 + $0x30] sm:$0xff]  ;;  %v501_v63 = vld [vmem:[%s493_s16 + $0x38] sm:$0xff]  ;;  %v498_v0 = vld [vmem:[%s493_s16 + $0x20] sm:$0xff]  ;;  %s1204_s11 = scalar_lea.vmem [#allocation2], %s877_s10 }
 0x16e   : > { %v505_v1 = vpack.c.bf16 %v501_v63, %v500_v62  ;;  %v499_v2 = vld [vmem:[%s493_s16 + $0x28] sm:$0xff]  ;;  %v496_v4 = vld [vmem:[%s493_s16 + $0x10] sm:$0xff]  ;;  %v497_v5 = vld [vmem:[%s493_s16 + $0x18] sm:$0xff] }
 0x16f   : > { %v504_v3 = vpack.c.bf16 %v499_v2, %v498_v0  ;;  %v503_v6 = vpack.c.bf16 %v497_v5, %v496_v4  ;;  %v494_v7 = vld [vmem:[%s493_s16] sm:$0xff]  ;;  %v495_v8 = vld [vmem:[%s493_s16 + $0x8] sm:$0xff] }
 0x170   : > { %551 = vmatpush.bf16.msra.mxu0 %v505_v1  ;;  %897 = vmatpush.bf16.msra.mxu1 %v505_v1  ;;  %v502_v9 = vpack.c.bf16 %v495_v8, %v494_v7  ;;  %v585_v14 = vstv %s584_s9 }
 0x171   : > { %898 = vmatpush.bf16.msra.mxu2 %v505_v1  ;;  %899 = vmatpush.bf16.msra.mxu3 %v505_v1 }
 0x174   : > { %552 = vmatpush.bf16.msra.mxu0 %v504_v3  ;;  %900 = vmatpush.bf16.msra.mxu1 %v504_v3 }
 0x175   : > { %901 = vmatpush.bf16.msra.mxu2 %v504_v3  ;;  %902 = vmatpush.bf16.msra.mxu3 %v504_v3 }
 0x178   : > { %553 = vmatpush.bf16.msra.mxu0 %v503_v6  ;;  %903 = vmatpush.bf16.msra.mxu1 %v503_v6 }
 0x179   : > { %904 = vmatpush.bf16.msra.mxu2 %v503_v6  ;;  %905 = vmatpush.bf16.msra.mxu3 %v503_v6 }
 0x17c   : > { %554 = vmatpush.bf16.msra.mxu0 %v502_v9  ;;  %906 = vmatpush.bf16.msra.mxu1 %v502_v9 }
 0x17d   : > { %907 = vmatpush.bf16.msra.mxu2 %v502_v9  ;;  %908 = vmatpush.bf16.msra.mxu3 %v502_v9 }
 0x17f   : > { %873 = vmatmul.msk.bf16.vlgmr.msra.gmra.mxu0 %vm534_vm2, %v890_v10  ;;  %874 = vmatmul.msk.bf16.vlgmr.msra.gmra.mxu1 %vm534_vm2, %v891_v11 }
 0x180   : > { %875 = vmatmul.msk.bf16.vlgmr.msra.gmra.mxu2 %vm534_vm2, %v892_v12  ;;  %876 = vmatmul.msk.bf16.vlgmr.msra.gmra.mxu3 %vm534_vm2, %v893_v13 }
 0x1fc   : > { %v556_v15 = vpop.f32.mrf.mxu0  ;;  %v561_v17 = vpop.f32.mrf.mxu1 }
 0x1fd   : > { %v586_v19 = vmul.f32 %v585_v14, %v556_v15  ;;  %612 = vst [vmem:[%s1204_s11] sm:$0xff] %v556_v15  ;;  %v588_v20 = vmul.f32 %v585_v14, %v561_v17 }
 0x1fe   : > { %614 = vst [vmem:[%s1204_s11 + $0x10] sm:$0xff] %v561_v17 }
 0x1ff   : > { %v594_v21 = vadd.f32 %v586_v19, %v576_v16  ;;  %v596_v22 = vadd.f32 %v588_v20, %v578_v18 }
 0x201   : > { %602 = vst [vmem:[#allocation8] sm:$0xff] %v594_v21 }
 0x202   : > { %604 = vst [vmem:[#allocation8 + $0x10] sm:$0xff] %v596_v22 }
 0x203   : > { %v566_v23 = vpop.f32.mrf.mxu2  ;;  %v571_v25 = vpop.f32.mrf.mxu3 }
 0x204   : > { %v590_v27 = vmul.f32 %v585_v14, %v566_v23  ;;  %616 = vst [vmem:[%s1204_s11 + $0x20] sm:$0xff] %v566_v23  ;;  %v592_v28 = vmul.f32 %v585_v14, %v571_v25  ;;  %v558_v29 = vpop.f32.mrf.mxu0  ;;  %v563_v31 = vpop.f32.mrf.mxu1 }
 0x205   : > { %618 = vst [vmem:[%s1204_s11 + $0x30] sm:$0xff] %v571_v25  ;;  %v587_v33 = vmul.f32 %v585_v14, %v558_v29  ;;  %v589_v34 = vmul.f32 %v585_v14, %v563_v31 }
 0x206   : > { %v598_v35 = vadd.f32 %v590_v27, %v580_v24  ;;  %v600_v36 = vadd.f32 %v592_v28, %v582_v26  ;;  %613 = vst [vmem:[%s1204_s11 + $0x8] sm:$0xff] %v558_v29 }
 0x207   : > { %v595_v37 = vadd.f32 %v587_v33, %v577_v30  ;;  %v597_v38 = vadd.f32 %v589_v34, %v579_v32  ;;  %615 = vst [vmem:[%s1204_s11 + $0x18] sm:$0xff] %v563_v31 }
 0x208   : > { %606 = vst [vmem:[#allocation8 + $0x20] sm:$0xff] %v598_v35 }
 0x209   : > { %608 = vst [vmem:[#allocation8 + $0x30] sm:$0xff] %v600_v36 }
 0x20a   : > { %603 = vst [vmem:[#allocation8 + $0x8] sm:$0xff] %v595_v37 }
 0x20b   : > { %605 = vst [vmem:[#allocation8 + $0x18] sm:$0xff] %v597_v38  ;;  %v568_v39 = vpop.f32.mrf.mxu2  ;;  %v573_v41 = vpop.f32.mrf.mxu3 }
 0x20c   : > { %v591_v43 = vmul.f32 %v585_v14, %v568_v39  ;;  %617 = vst [vmem:[%s1204_s11 + $0x28] sm:$0xff] %v568_v39  ;;  %v593_v44 = vmul.f32 %v585_v14, %v573_v41 }
 0x20d   : > { %619 = vst [vmem:[%s1204_s11 + $0x38] sm:$0xff] %v573_v41 }
 0x20e   : > { %v599_v45 = vadd.f32 %v591_v43, %v581_v40  ;;  %v601_v46 = vadd.f32 %v593_v44, %v583_v42 }
 0x210   : > { %607 = vst [vmem:[#allocation8 + $0x28] sm:$0xff] %v599_v45 }
 0x211   : > { %609 = vst [vmem:[#allocation8 + $0x38] sm:$0xff] %v601_v46 }
 0x212 PF: > { %p878_p12 = scmp.ne.s32.totalorder %s1132_s28, 10 }
 0x214   : > { %623 = sbr.rel (%p878_p12) target bundleno = 825 (0x339), region = 68 }
 0x219   : > { %v632_v47 = vlaneseq  ;;  %v628_v48 = vld [vmem:[#allocation8 + $0x20] sm:$0xff]  ;;  %v626_v50 = vld [vmem:[#allocation8 + $0x10] sm:$0xff]  ;;  %v629_v55 = vld [vmem:[#allocation8 + $0x28] sm:$0xff] }
 0x21a   : > { %v624_v51 = vld [vmem:[#allocation8] sm:$0xff]  ;;  %v627_v56 = vld [vmem:[#allocation8 + $0x18] sm:$0xff]  ;;  %v625_v57 = vld [vmem:[#allocation8 + $0x8] sm:$0xff] }
 0x21b   : > { %v1215_v49 = vand.u32 127, %v632_v47  ;;  %v631_v61 = vld [vmem:[#allocation8 + $0x38] sm:$0xff]  ;;  %v630_v62 = vld [vmem:[#allocation8 + $0x30] sm:$0xff] }
 0x21d   : > { %vm634_vm3 = vcmp.lt.s32.totalorder %v1215_v49, 4 }
 0x21e   : > { %v639_v52 = vsel %vm634_vm3, %v628_v48, -inf  ;;  %v637_v53 = vsel %vm634_vm3, %v626_v50, -inf  ;;  %v635_v54 = vsel %vm634_vm3, %v624_v51, -inf  ;;  %v640_v58 = vsel %vm634_vm3, %v629_v55, -inf }
 0x21f   : > { %651 = vmax.xlane.f32.xlu2 %v639_v52  ;;  %647 = vmax.xlane.f32.xlu1 %v637_v53  ;;  %v638_v59 = vsel %vm634_vm3, %v627_v56, -inf  ;;  %v636_v60 = vsel %vm634_vm3, %v625_v57, -inf  ;;  %v642_v63 = vsel %vm634_vm3, %v631_v61, -inf  ;;  %v641_v0 = vsel %vm634_vm3, %v630_v62, -inf }
 0x220   : > { %643 = vmax.xlane.f32.xlu0 %v635_v54 }
 0x227   : > { %653 = vmax.xlane.f32.xlu2 %v640_v58  ;;  %649 = vmax.xlane.f32.xlu1 %v638_v59 }
 0x228   : > { %645 = vmax.xlane.f32.xlu0 %v636_v60 }
 0x22f   : > { %657 = vmax.xlane.f32.xlu1 %v642_v63 }
 0x230   : > { %655 = vmax.xlane.f32.xlu0 %v641_v0 }
 0x292   : > { %v652_v1 = vpop.xlane.xlu2 %651  ;;  %v648_v2 = vpop.xlane.xlu1 %647 }
 0x293   : > { %v1234_v3 = vsub.f32 %v637_v53, %v648_v2  ;;  %v644_v4 = vpop.xlane.xlu0 %643  ;;  %v1249_v19 = vsub.f32 %v639_v52, %v652_v1 }
 0x294   : > { %v1236_v5 = vsub.f32 %v635_v54, %v644_v4 }
 0x295   : > { %v671_v6 = vmul.f32 1.442695, %v1234_v3  ;;  %v675_v20 = vmul.f32 1.442695, %v1249_v19 }
 0x296   : > { %v667_v7 = vmul.f32 1.442695, %v1236_v5 }
 0x297   : > { %951 = vpow2.f32 %v671_v6 }
 0x298   : > { %953 = vpow2.f32 %v667_v7 }
 0x29a   : > { %v654_v8 = vpop.xlane.xlu2 %653  ;;  %v650_v9 = vpop.xlane.xlu1 %649 }
 0x29b   : > { %v1240_v10 = vsub.f32 %v640_v58, %v654_v8  ;;  %v1242_v11 = vsub.f32 %v638_v59, %v650_v9  ;;  %v646_v12 = vpop.xlane.xlu0 %645 }
 0x29c   : > { %v1244_v13 = vsub.f32 %v636_v60, %v646_v12 }
 0x29d   : > { %v677_v14 = vmul.f32 1.442695, %v1240_v10  ;;  %v673_v15 = vmul.f32 1.442695, %v1242_v11  ;;  %v952_v16 = vpop.eup %951 }
 0x29e   : > { %v669_v17 = vmul.f32 1.442695, %v1244_v13  ;;  %v954_v18 = vpop.eup %953  ;;  %687 = vadd.xlane.f32.xlu1 %v952_v16 }
 0x29f   : > { %955 = vpow2.f32 %v677_v14  ;;  %683 = vadd.xlane.f32.xlu2 %v954_v18 }
 0x2a0   : > { %957 = vpow2.f32 %v673_v15 }
 0x2a1   : > { %959 = vpow2.f32 %v669_v17 }
 0x2a2   : > { %v658_v23 = vpop.xlane.xlu1 %657  ;;  %961 = vpow2.f32 %v675_v20 }
 0x2a3   : > { %v656_v21 = vpop.xlane.xlu0 %655  ;;  %v1255_v28 = vsub.f32 %v642_v63, %v658_v23 }
 0x2a4   : > { %v1252_v22 = vsub.f32 %v641_v0, %v656_v21 }
 0x2a5   : > { %v956_v24 = vpop.eup %955  ;;  %v681_v29 = vmul.f32 1.442695, %v1255_v28 }
 0x2a6   : > { %v958_v25 = vpop.eup %957  ;;  %v679_v26 = vmul.f32 1.442695, %v1252_v22  ;;  %693 = vadd.xlane.f32.xlu1 %v956_v24 }
 0x2a7   : > { %v960_v27 = vpop.eup %959  ;;  %689 = vadd.xlane.f32.xlu2 %v958_v25 }
 0x2a8   : > { %963 = vpow2.f32 %v679_v26  ;;  %685 = vadd.xlane.f32.xlu0 %v960_v27  ;;  %v962_v30 = vpop.eup %961 }
 0x2a9   : > { %965 = vpow2.f32 %v681_v29 }
 0x2ae   : > { %v964_v31 = vpop.eup %963 }
 0x2af   : > { %695 = vadd.xlane.f32.xlu2 %v964_v31  ;;  %v966_v32 = vpop.eup %965 }
 0x2b0   : > { %691 = vadd.xlane.f32.xlu0 %v962_v30 }
 0x2b8   : > { %697 = vadd.xlane.f32.xlu0 %v966_v32 }
 0x311   : > { %v688_v33 = vpop.xlane.xlu1 %687 }
 0x312   : > { %967 = vlog2.f32 %v688_v33  ;;  %v684_v34 = vpop.xlane.xlu2 %683 }
 0x313   : > { %969 = vlog2.f32 %v684_v34 }
 0x318   : > { %v968_v35 = vpop.eup %967 }
 0x319   : > { %v970_v36 = vpop.eup %969  ;;  %v704_v37 = vmul.f32 0.6931472, %v968_v35  ;;  %v694_v38 = vpop.xlane.xlu1 %693 }
 0x31a   : > { %v700_v39 = vmul.f32 0.6931472, %v970_v36  ;;  %971 = vlog2.f32 %v694_v38  ;;  %v690_v40 = vpop.xlane.xlu2 %689 }
 0x31b   : > { %v686_v41 = vpop.xlane.xlu0 %685  ;;  %v717_v42 = vsub.f32 %v1234_v3, %v704_v37  ;;  %973 = vlog2.f32 %v690_v40 }
 0x31c   : > { %v715_v43 = vsub.f32 %v1236_v5, %v700_v39  ;;  %975 = vlog2.f32 %v686_v41 }
 0x31d   : > { %v725_v44 = vsel %vm634_vm3, %v717_v42, 0.0 }
 0x31e   : > { %733 = vst [vmem:[#allocation8 + $0x10] sm:$0xff] %v725_v44  ;;  %v723_v45 = vsel %vm634_vm3, %v715_v43, 0.0 }
 0x31f   : > { %731 = vst [vmem:[#allocation8] sm:$0xff] %v723_v45 }
 0x320   : > { %v972_v46 = vpop.eup %971 }
 0x321   : > { %v974_v47 = vpop.eup %973  ;;  %v710_v48 = vmul.f32 0.6931472, %v972_v46 }
 0x322   : > { %v976_v50 = vpop.eup %975  ;;  %v706_v51 = vmul.f32 0.6931472, %v974_v47  ;;  %v696_v52 = vpop.xlane.xlu2 %695 }
 0x323   : > { %v692_v53 = vpop.xlane.xlu0 %691  ;;  %v720_v54 = vsub.f32 %v1240_v10, %v710_v48  ;;  %v702_v55 = vmul.f32 0.6931472, %v976_v50  ;;  %977 = vlog2.f32 %v696_v52 }
 0x324   : > { %v718_v56 = vsub.f32 %v1242_v11, %v706_v51  ;;  %979 = vlog2.f32 %v692_v53 }
 0x325   : > { %v728_v57 = vsel %vm634_vm3, %v720_v54, 0.0  ;;  %v716_v58 = vsub.f32 %v1244_v13, %v702_v55 }
 0x326   : > { %736 = vst [vmem:[#allocation8 + $0x28] sm:$0xff] %v728_v57  ;;  %v726_v59 = vsel %vm634_vm3, %v718_v56, 0.0 }
 0x327   : > { %734 = vst [vmem:[#allocation8 + $0x18] sm:$0xff] %v726_v59  ;;  %v724_v60 = vsel %vm634_vm3, %v716_v58, 0.0 }
 0x328   : > { %732 = vst [vmem:[#allocation8 + $0x8] sm:$0xff] %v724_v60 }
 0x329   : > { %v978_v61 = vpop.eup %977 }
 0x32a   : > { %v980_v62 = vpop.eup %979  ;;  %v712_v63 = vmul.f32 0.6931472, %v978_v61 }
 0x32b   : > { %v698_v0 = vpop.xlane.xlu0 %697  ;;  %v708_v1 = vmul.f32 0.6931472, %v980_v62 }
 0x32c   : > { %981 = vlog2.f32 %v698_v0  ;;  %v721_v2 = vsub.f32 %v1252_v22, %v712_v63 }
 0x32d   : > { %v719_v3 = vsub.f32 %v1249_v19, %v708_v1 }
 0x32e   : > { %v729_v4 = vsel %vm634_vm3, %v721_v2, 0.0 }
 0x32f   : > { %737 = vst [vmem:[#allocation8 + $0x30] sm:$0xff] %v729_v4  ;;  %v727_v5 = vsel %vm634_vm3, %v719_v3, 0.0 }
 0x330   : > { %735 = vst [vmem:[#allocation8 + $0x20] sm:$0xff] %v727_v5 }
 0x332   : > { %v982_v6 = vpop.eup %981 }
 0x333   : > { %v714_v7 = vmul.f32 0.6931472, %v982_v6 }
 0x335   : > { %v722_v8 = vsub.f32 %v1255_v28, %v714_v7 }
 0x337   : > { %v730_v9 = vsel %vm634_vm3, %v722_v8, 0.0 }
 0x338   : > { %738 = vst [vmem:[#allocation8 + $0x38] sm:$0xff] %v730_v9 }
 0x339 PF: > { %p932_p13 = scmp.eq.s32.totalorder %s1132_s28, 10  ;;  %s1080_s12 = smov [#allocation8]  }
 0x33a   : > { %s744_s13 = sshll.u32 %s1080_s12, 4  ;;  %s746_s16 = sshll.u32 %s1296_s7, 4  ;;  %s745_s13 = int_to_ptr.vmem [resolvable:$true] %s744_s13  ;;  %s747_s16 = int_to_ptr.hbm [resolvable:$true] %s746_s16 }
 0x33b   : > { %s1081_s17 = smov 128   ;;  %s1082_s18 = smov 8  }
 0x33c   : > { %918 = dma.vmem_to_hbm [thread:$0]  (%p932_p13), %s745_s13, 1024, %s747_s16, [#allocation5], %s1081_s17, %s1081_s17, %s1082_s18  }
 0x33d   : > { %1069 = dma.done.wait (%p932_p13), [#allocation5], 1024  }
 0x33e   : > { %1071 = vsyncadd (%p932_p13), [#allocation5], 4294966272 }
 0x33f PF: > { %s20_s24 = sadd.s32 1, %s1074_s24  }
 0x340   : > { %p17_p0 = scmp.ge.s32.totalorder %s20_s24, 13  }
 0x342   :  { %19 = sbr.rel (!%p17_p0) target bundleno = 3 (0x3), region = 96 }
 0x347   :  { %763 = vsyncpa [#allocation4], 1 }
 0x348   :  { %765 = vsyncpa [#allocation4 + $0x1], 1 }
 0x349   :  { %766 = vsyncpa [#allocation5], 1 }
 0x34a   :  { %768 = vsyncpa [#allocation5 + $0x1], 1 }
 0x34b   :  { %769 = vsyncpa [#allocation6], 1 }
 0x34c   :  { %771 = vsyncpa [#allocation6 + $0x1], 1 }

</bundles_post_ra>
